<compile_context>
chip_gen: v7x
topology: tpu7x:2x2x1
jax: 0.10.0
libtpu: 0.0.40
codegen_flags: <defaults>
</compile_context>

<pallas_src>
import functools

import jax
import jax.numpy as jnp
from jax import lax
from jax.experimental import pallas as pl
from jax.experimental.pallas import tpu as pltpu

LANE = 128
SUBLANE = 8


def _mae_kernel(x_ref, y_ref, o_ref, *, tile_rows, tiles_per_split, rows_valid):
    i = pl.program_id(0)   # core-split axis ("parallel")
    j = pl.program_id(1)   # sequential reduction axis ("arbitrary")

    @pl.when(j == 0)
    def _():
        o_ref[...] = jnp.zeros_like(o_ref)

    row0 = (i * tiles_per_split + j) * tile_rows
    # Every tile except (at most) the global last one is fully in range.
    is_full = row0 + tile_rows <= rows_valid

    # Fast path: interior tile -- pure sub/abs/add, no masking.
    @pl.when(is_full)
    def _():
        d = jnp.abs(x_ref[...] - y_ref[...]).astype(jnp.float32)
        o_ref[...] += d.reshape(tile_rows // SUBLANE, SUBLANE, LANE).sum(axis=0)

    # Masked epilogue: only the tile straddling the logical end.  Rows past
    # `rows_valid` hold undefined data from the clipped DMA and MUST be
    # masked out before accumulating.
    @pl.when(jnp.logical_not(is_full))
    def _():
        row_ids = lax.broadcasted_iota(jnp.int32, (tile_rows, LANE), 0) + row0
        d = jnp.abs(x_ref[...] - y_ref[...]).astype(jnp.float32)
        d = jnp.where(row_ids < rows_valid, d, jnp.float32(0.0))
        o_ref[...] += d.reshape(tile_rows // SUBLANE, SUBLANE, LANE).sum(axis=0)


def mae_loss(inputs, targets, *, tile_rows=8192):
    assert inputs.shape == targets.shape, "inputs/targets must have same shape"
    out_dtype = inputs.dtype
    if targets.dtype != inputs.dtype:
        targets = targets.astype(inputs.dtype)
    n = inputs.size

    x = inputs.reshape(-1)
    y = targets.reshape(-1)

    # Pad (native dtype) to a multiple of 8*128 so the (rows, 128) view has
    # sublane-aligned rows; |0 - 0| = 0 so the padding never changes the sum.
    block_elems = SUBLANE * LANE
    rem = n % block_elems
    if rem:
        pad = block_elems - rem
        x = jnp.pad(x, (0, pad))
        y = jnp.pad(y, (0, pad))

    rows = x.size // LANE
    x2 = x.reshape(rows, LANE)
    y2 = y.reshape(rows, LANE)

    # Keep tile_rows a multiple of the sublane count and <= the array extent.
    tile_rows = max(SUBLANE, (tile_rows // SUBLANE) * SUBLANE)
    if rows <= tile_rows:
        tile_rows = rows

    row_tiles = pl.cdiv(rows, tile_rows)
    # 2-way split only when it costs nothing (even tile count -> no clamped /
    # duplicate tiles).  On v7x "parallel" maps the halves onto both
    # TensorCores; on single-TC chips it is the same sequential work.
    num_splits = 2 if (row_tiles >= 2 and row_tiles % 2 == 0) else 1
    tiles_per_split = row_tiles // num_splits

    def in_index(i, j):
        return (i * tiles_per_split + j, 0)

    kernel = functools.partial(
        _mae_kernel,
        tile_rows=tile_rows,
        tiles_per_split=tiles_per_split,
        rows_valid=rows,
    )

    partials = pl.pallas_call(
        kernel,
        out_shape=jax.ShapeDtypeStruct((num_splits * SUBLANE, LANE), jnp.float32),
        grid_spec=pltpu.PrefetchScalarGridSpec(
            num_scalar_prefetch=0,
            grid=(num_splits, tiles_per_split),
            in_specs=[
                pl.BlockSpec((tile_rows, LANE), in_index),
                pl.BlockSpec((tile_rows, LANE), in_index),
            ],
            # Same block index across j -> the (8, 128) partial stays resident
            # in VMEM and acts as the accumulator; written back once per split.
            out_specs=pl.BlockSpec((SUBLANE, LANE), lambda i, j: (i, 0)),
        ),
        compiler_params=pltpu.CompilerParams(
            dimension_semantics=("parallel", "arbitrary"),
            vmem_limit_bytes=32 * 1024 * 1024,
        ),
    )(x2, y2)

    # Tiny final combine (<= 2048 f32) + normalization in the wrapper.
    # Note: f32(n) rounds for n >= 2^24 (<= ~6e-8 relative error) -- well
    # inside the stated tolerance.
    total = jnp.sum(partials, dtype=jnp.float32)
    return (total / jnp.float32(n)).astype(out_dtype)


if __name__ == "__main__":
    key = jax.random.PRNGKey(0)
    k1, k2 = jax.random.split(key)

    # Small shapes consistent with a UNet-style output: (B, C, H, W)
    inputs = jax.random.normal(k1, (2, 4, 16, 16), dtype=jnp.float32)
    targets = jax.random.normal(k2, (2, 4, 16, 16), dtype=jnp.float32)

    loss = mae_loss(inputs, targets)
    jax.block_until_ready(loss)

    # Reference check (same semantics as torch.abs(a - b).mean()).
    ref = jnp.abs(inputs - targets).mean()
    assert jnp.allclose(loss, ref, rtol=1e-5, atol=1e-6), (loss, ref)

    print("KERNEL_OK")
</pallas_src>

<mosaic_0001>
module attributes {stable_mosaic.version = 11 : i64} {
  func.func @_mae_kernel(%arg0: i32, %arg1: i32, %arg2: memref<16x128xf32, #tpu.memory_space<vmem>>, %arg3: memref<16x128xf32, #tpu.memory_space<vmem>>, %arg4: memref<8x128xf32, #tpu.memory_space<vmem>>) attributes {dimension_semantics = [#tpu.dimension_semantics<parallel>, #tpu.dimension_semantics<arbitrary>], iteration_bounds = array<i64: 1, 1>, scalar_prefetch = 0 : i64, scratch_operands = 0 : i64, tpu.core_type = #tpu.core_type<tc>, window_params = [{transform_indices = @transform_0, window_bounds = array<i64: 16, 128>}, {transform_indices = @transform_1, window_bounds = array<i64: 16, 128>}, {transform_indices = @transform_2, window_bounds = array<i64: 8, 128>}]} {
    %c0_i32 = arith.constant 0 : i32
    %0 = arith.cmpi eq, %arg1, %c0_i32 : i32
    %1 = arith.extui %0 : i1 to i32
    %c0_i32_0 = arith.constant 0 : i32
    %2 = arith.cmpi ne, %1, %c0_i32_0 : i32
    scf.if %2 {
      %cst = arith.constant 0.000000e+00 : f32
      %13 = vector.broadcast %cst : f32 to vector<8x128xf32>
      %c0 = arith.constant 0 : index
      %c0_5 = arith.constant 0 : index
      %14 = vector.load %arg4[%c0, %c0_5] : memref<8x128xf32, #tpu.memory_space<vmem>>, vector<8x128xf32>
      tpu.vector_store %arg4[%c0, %c0_5], %13 {strides = array<i32>} : memref<8x128xf32, #tpu.memory_space<vmem>>, vector<8x128xf32>,
    } else {
    }
    %c1_i32 = arith.constant 1 : i32
    %3 = arith.muli %arg0, %c1_i32 : i32
    %4 = arith.addi %3, %arg1 : i32
    %c16_i32 = arith.constant 16 : i32
    %5 = arith.muli %4, %c16_i32 : i32
    %c16_i32_1 = arith.constant 16 : i32
    %6 = arith.addi %5, %c16_i32_1 : i32
    %c16_i32_2 = arith.constant 16 : i32
    %7 = arith.cmpi sle, %6, %c16_i32_2 : i32
    %8 = arith.extui %7 : i1 to i32
    %c0_i32_3 = arith.constant 0 : i32
    %9 = arith.cmpi ne, %8, %c0_i32_3 : i32
    scf.if %9 {
      %c0 = arith.constant 0 : index
      %c0_5 = arith.constant 0 : index
      %13 = vector.load %arg2[%c0, %c0_5] : memref<16x128xf32, #tpu.memory_space<vmem>>, vector<16x128xf32>
      %c0_6 = arith.constant 0 : index
      %c0_7 = arith.constant 0 : index
      %14 = vector.load %arg3[%c0_6, %c0_7] : memref<16x128xf32, #tpu.memory_space<vmem>>, vector<16x128xf32>
      %15 = arith.subf %13, %14 : vector<16x128xf32>
      %16 = math.absf %15 : vector<16x128xf32>
      %c0_8 = arith.constant 0 : index
      %c0_9 = arith.constant 0 : index
      %17 = vector.load %arg4[%c0_8, %c0_9] : memref<8x128xf32, #tpu.memory_space<vmem>>, vector<8x128xf32>
      %18 = vector.shape_cast %16 : vector<16x128xf32> to vector<2x8x128xf32>
      %cst = arith.constant dense<0.000000e+00> : vector<8x128xf32>
      %19 = vector.multi_reduction <add>, %18, %cst [0] : vector<2x8x128xf32> to vector<8x128xf32>
      %20 = arith.addf %17, %19 : vector<8x128xf32>
      %c0_10 = arith.constant 0 : index
      %c0_11 = arith.constant 0 : index
      %21 = vector.load %arg4[%c0_10, %c0_11] : memref<8x128xf32, #tpu.memory_space<vmem>>, vector<8x128xf32>
      tpu.vector_store %arg4[%c0_10, %c0_11], %20 {strides = array<i32>} : memref<8x128xf32, #tpu.memory_space<vmem>>, vector<8x128xf32>,
    } else {
    }
    %true = arith.constant true
    %10 = arith.xori %7, %true : i1
    %11 = arith.extui %10 : i1 to i32
    %c0_i32_4 = arith.constant 0 : i32
    %12 = arith.cmpi ne, %11, %c0_i32_4 : i32
    scf.if %12 {
      %13 = tpu.iota {dimensions = array<i32: 0>} : vector<16x128xi32>
      %14 = vector.broadcast %5 : i32 to vector<16x128xi32>
      %15 = arith.addi %13, %14 : vector<16x128xi32>
      %c0 = arith.constant 0 : index
      %c0_5 = arith.constant 0 : index
      %16 = vector.load %arg2[%c0, %c0_5] : memref<16x128xf32, #tpu.memory_space<vmem>>, vector<16x128xf32>
      %c0_6 = arith.constant 0 : index
      %c0_7 = arith.constant 0 : index
      %17 = vector.load %arg3[%c0_6, %c0_7] : memref<16x128xf32, #tpu.memory_space<vmem>>, vector<16x128xf32>
      %18 = arith.subf %16, %17 : vector<16x128xf32>
      %19 = math.absf %18 : vector<16x128xf32>
      %c16_i32_8 = arith.constant 16 : i32
      %20 = vector.broadcast %c16_i32_8 : i32 to vector<16x128xi32>
      %21 = arith.cmpi slt, %15, %20 : vector<16x128xi32>
      %cst = arith.constant 0.000000e+00 : f32
      %22 = vector.broadcast %cst : f32 to vector<16x128xf32>
      %23 = arith.select %21, %19, %22 : vector<16x128xi1>, vector<16x128xf32>
      %c0_9 = arith.constant 0 : index
      %c0_10 = arith.constant 0 : index
      %24 = vector.load %arg4[%c0_9, %c0_10] : memref<8x128xf32, #tpu.memory_space<vmem>>, vector<8x128xf32>
      %25 = vector.shape_cast %23 : vector<16x128xf32> to vector<2x8x128xf32>
      %cst_11 = arith.constant dense<0.000000e+00> : vector<8x128xf32>
      %26 = vector.multi_reduction <add>, %25, %cst_11 [0] : vector<2x8x128xf32> to vector<8x128xf32>
      %27 = arith.addf %24, %26 : vector<8x128xf32>
      %c0_12 = arith.constant 0 : index
      %c0_13 = arith.constant 0 : index
      %28 = vector.load %arg4[%c0_12, %c0_13] : memref<8x128xf32, #tpu.memory_space<vmem>>, vector<8x128xf32>
      tpu.vector_store %arg4[%c0_12, %c0_13], %27 {strides = array<i32>} : memref<8x128xf32, #tpu.memory_space<vmem>>, vector<8x128xf32>,
    } else {
    }
    return
  }
  func.func @transform_0(%arg0: i32, %arg1: i32) -> (i32, i32) {
    %c1_i32 = arith.constant 1 : i32
    %0 = arith.muli %arg0, %c1_i32 : i32
    %1 = arith.addi %0, %arg1 : i32
    %c0_i32 = arith.constant 0 : i32
    %c0_i32_0 = arith.constant 0 : i32
    return %1, %c0_i32 : i32, i32
  }
  func.func @transform_1(%arg0: i32, %arg1: i32) -> (i32, i32) {
    %c1_i32 = arith.constant 1 : i32
    %0 = arith.muli %arg0, %c1_i32 : i32
    %1 = arith.addi %0, %arg1 : i32
    %c0_i32 = arith.constant 0 : i32
    %c0_i32_0 = arith.constant 0 : i32
    return %1, %c0_i32 : i32, i32
  }
  func.func @transform_2(%arg0: i32, %arg1: i32) -> (i32, i32) {
    %c0_i32 = arith.constant 0 : i32
    %c0_i32_0 = arith.constant 0 : i32
    return %arg0, %c0_i32 : i32, i32
  }
}

</mosaic_0001>

<bundles_post_ra>
// kernel: tpu_custom_call.1
= control target key start
LH: loop header
LB: loop body
LE: loop exit
PB: predicated region body
PF: predicated region fallthrough
CT: control target
= control target key end

     0   :  { %7 = vsyncpa [#allocation3], 0  ;;  %s252_s0 = inlined_call_operand.hbm [shape: f32[16,128], index: 0, kind: input, shape index: {}]   ;;  %s253_s1 = inlined_call_operand.hbm [shape: f32[16,128], index: 1, kind: input, shape index: {}]   ;;  %s254_s2 = inlined_call_operand.hbm [shape: f32[8,128], index: 2, kind: output, shape index: {}]  }
   0x1   :  { %8 = vsyncpa [#allocation6], 0 }
   0x2   :  { %9 = vsyncpa [#allocation4], 0  ;;  %s196_s9 = smov [#allocation2]   ;;  %s124_s13 = scalar_lea.hbm %s252_s0, 256 }
   0x3   :  { %s19_s10 = sshll.u32 %s196_s9, 4  ;;  %p125_p0 = scmp.ne.s32.totalorder %s252_s0, %s124_s13  ;;  %s20_s10 = int_to_ptr.vmem [resolvable:$true] %s19_s10 }
   0x4   :  { %p128_p1 = scmp.lt.u32.totalorder %s124_s13, %s252_s0 }
   0x6   :  { %p130_p2 = pnand %p128_p1, %p125_p0 }
   0x8   :  { %133 = shalt.err (!%p130_p2)
}
   0x9   :  { %s134_s18 = scalar_lea.vmem %s20_s10, 256  ;;  %p139_p4 = scmp.lt.s32.totalorder %s20_s10, %s20_s10 }
   0xa   :  { %p135_p3 = scmp.ne.s32.totalorder %s20_s10, %s134_s18  ;;  %p140_p5 = scmp.lt.s32.totalorder %s134_s18, %s134_s18 }
   0xc   :  { %p141_p6 = por %p140_p5, %p139_p4 }
   0xe   :  { %p142_p7 = pnand %p141_p6, %p135_p3 }
  0x10   :  { %145 = shalt.err (!%p142_p7)
}
  0x11   :  { %s197_s19 = smov 128   ;;  %s198_s20 = smov 8  }
  0x12   :  { %25 = dma.hbm_to_vmem [thread:$0]  %s252_s0, 256, %s20_s10, [#allocation3], %s197_s19, %s197_s19, %s198_s20  }
  0x13   :  { %s199_s23 = smov [#allocation5]   ;;  %s146_s27 = scalar_lea.hbm %s253_s1, 256 }
  0x14   :  { %s35_s24 = sshll.u32 %s199_s23, 4  ;;  %p147_p8 = scmp.ne.s32.totalorder %s253_s1, %s146_s27  ;;  %s36_s24 = int_to_ptr.vmem [resolvable:$true] %s35_s24 }
  0x15   :  { %p150_p9 = scmp.lt.u32.totalorder %s146_s27, %s253_s1 }
  0x17   :  { %p152_p10 = pnand %p150_p9, %p147_p8 }
  0x19   :  { %155 = shalt.err (!%p152_p10)
}
  0x1a   :  { %s156_s4 = scalar_lea.vmem %s36_s24, 256  ;;  %p161_p12 = scmp.lt.s32.totalorder %s36_s24, %s36_s24 }
  0x1b   :  { %p157_p11 = scmp.ne.s32.totalorder %s36_s24, %s156_s4  ;;  %p162_p13 = scmp.lt.s32.totalorder %s156_s4, %s156_s4 }
  0x1d   :  { %p163_p0 = por %p162_p13, %p161_p12 }
  0x1f   :  { %p164_p1 = pnand %p163_p0, %p157_p11 }
  0x21   :  { %167 = shalt.err (!%p164_p1)
}
  0x22   :  { %41 = dma.hbm_to_vmem [thread:$0]  %s253_s1, 256, %s36_s24, [#allocation6], %s197_s19, %s197_s19, %s198_s20  }
  0x23   :  { %190 = dma.done.wait [#allocation3], 256  }
  0x24   :  { %191 = vsyncadd [#allocation3], 4294967040 }
  0x25   :  { %192 = dma.done.wait [#allocation6], 256  }
  0x26   :  { %193 = vsyncadd [#allocation6], 4294967040  ;;  %v64_v0 = vld [vmem:[#allocation2] sm:$0xff]  ;;  %v65_v1 = vld [vmem:[#allocation2 + $0x8] sm:$0xff]  ;;  %s200_s6 = smov [#allocation7]  }
  0x27   :  { %v66_v2 = vld [vmem:[#allocation5] sm:$0xff]  ;;  %v67_v3 = vld [vmem:[#allocation5 + $0x8] sm:$0xff]  ;;  %s108_s7 = sshll.u32 %s200_s6, 4  ;;  %s109_s7 = int_to_ptr.vmem [resolvable:$true] %s108_s7 }
  0x28   :  { %v68_v4 = vsub.f32 %v64_v0, %v66_v2  ;;  %v69_v5 = vsub.f32 %v65_v1, %v67_v3  ;;  %s168_s8 = scalar_lea.vmem %s109_s7, 128  ;;  %p173_p3 = scmp.lt.s32.totalorder %s109_s7, %s109_s7 }
  0x29   :  { %p169_p2 = scmp.ne.s32.totalorder %s109_s7, %s168_s8  ;;  %p174_p4 = scmp.lt.s32.totalorder %s168_s8, %s168_s8 }
  0x2a   :  { %v70_v6 = vand.u32 2147483647, %v68_v4  ;;  %v71_v7 = vand.u32 2147483647, %v69_v5 }
  0x2b   :  { %p175_p5 = por %p174_p4, %p173_p3 }
  0x2c   :  { %v73_v8 = vadd.f32 %v71_v7, %v70_v6 }
  0x2d   :  { %p176_p6 = pnand %p175_p5, %p169_p2 }
  0x2e   :  { %75 = vst [vmem:[#allocation7] sm:$0xff] %v73_v8 }
  0x2f   :  { %179 = shalt.err (!%p176_p6)
}
  0x30   :  { %s180_s10 = scalar_lea.hbm %s254_s2, 128 }
  0x31   :  { %p181_p7 = scmp.ne.s32.totalorder %s254_s2, %s180_s10  ;;  %p184_p8 = scmp.lt.u32.totalorder %s180_s10, %s254_s2 }
  0x33   :  { %p186_p9 = pnand %p184_p8, %p181_p7 }
  0x35   :  { %189 = shalt.err (!%p186_p9)
}
  0x36   :  { %111 = dma.vmem_to_hbm [thread:$0]  %s109_s7, 128, %s254_s2, [#allocation4]  }
  0x37   :  { %194 = dma.done.wait [#allocation4], 128  }
  0x38   :  { %195 = vsyncadd [#allocation4], 4294967168 }
  0x39   :  { %115 = vsyncpa [#allocation3], 1 }
  0x3a   :  { %116 = vsyncpa [#allocation6], 1 }
  0x3b   :  { %117 = vsyncpa [#allocation4], 1 }

</bundles_post_ra>
